<compile_context>
chip_gen: v6e
topology: v6e:2x2x1
jax: 0.10.0
libtpu: 0.0.40
codegen_flags: <defaults>
</compile_context>

<pallas_src>
import jax
import jax.numpy as jnp
from jax.experimental import pallas as pl
from jax.experimental.pallas import tpu as pltpu


# ------------------------- zero-copy (aliased) path -------------------------

def _alias_noop_kernel(x_hbm_ref, o_hbm_ref):
    # Output is aliased to the input HBM buffer; nothing to move or compute.
    del x_hbm_ref, o_hbm_ref


def _identity_alias(x):
    return pl.pallas_call(
        _alias_noop_kernel,
        out_shape=jax.ShapeDtypeStruct(x.shape, x.dtype),
        in_specs=[pl.BlockSpec(memory_space=pl.ANY)],
        out_specs=pl.BlockSpec(memory_space=pl.ANY),
        input_output_aliases={0: 0},
    )(x)


# Donating wrapper: with donate_argnums the aliasing is honored by XLA and no
# HBM traffic is generated at all (true nn.Identity cost: zero).  The caller's
# input buffer is consumed, as with any donated buffer.
identity_donated = jax.jit(_identity_alias, donate_argnums=0)


# ----------------------- HBM->HBM direct-DMA copy path ----------------------

_MAX_INFLIGHT = 4            # max concurrent DMAs (overlap read/write streams)
_MIN_CHUNK_BYTES = 1 << 20   # only split when each chunk is >= 1 MiB


def _make_dma_copy_kernel(chunks):
    """chunks: None (single whole-array DMA) or tuple of (start, size) rows."""

    def kernel(x_hbm_ref, o_hbm_ref, sem):
        if chunks is None:
            cp = pltpu.make_async_copy(x_hbm_ref, o_hbm_ref, sem.at[0])
            cp.start()
            cp.wait()
        else:
            copies = []
            for i, (start, size) in enumerate(chunks):
                cp = pltpu.make_async_copy(
                    x_hbm_ref.at[pl.ds(start, size)],
                    o_hbm_ref.at[pl.ds(start, size)],
                    sem.at[i],
                )
                cp.start()            # issue all DMAs back-to-back ...
                copies.append(cp)
            for cp in copies:         # ... then drain; they run concurrently.
                cp.wait()

    return kernel


def _row_chunks(x):
    """Split the leading axis into up to _MAX_INFLIGHT chunks of >= 1 MiB."""
    if x.ndim == 0 or x.shape[0] < 2:
        return None
    total_bytes = x.size * x.dtype.itemsize
    n = min(_MAX_INFLIGHT, x.shape[0], max(1, total_bytes // _MIN_CHUNK_BYTES))
    if n < 2:
        return None
    base, rem = divmod(x.shape[0], n)
    chunks, start = [], 0
    for i in range(n):
        size = base + (1 if i < rem else 0)
        chunks.append((start, size))
        start += size
    return tuple(chunks)


def _identity_dma_copy(x):
    if x.size == 0:
        return x
    squeeze = x.ndim == 0
    x_arr = x.reshape(1) if squeeze else x

    chunks = _row_chunks(x_arr)
    n_sems = 1 if chunks is None else len(chunks)

    y = pl.pallas_call(
        _make_dma_copy_kernel(chunks),
        out_shape=jax.ShapeDtypeStruct(x_arr.shape, x_arr.dtype),
        in_specs=[pl.BlockSpec(memory_space=pl.ANY)],
        out_specs=pl.BlockSpec(memory_space=pl.ANY),
        scratch_shapes=[pltpu.SemaphoreType.DMA((n_sems,))],
    )(x_arr)
    return y.reshape(x.shape) if squeeze else y


# --------------------------------- wrapper ----------------------------------

def identity(x, *, materialize=True):
    """Forward pass of nn.Identity: returns the input unchanged.

    materialize=True  (default): non-destructive HBM->HBM DMA copy (no VMEM
                      bounce, no grid-pipeline overhead, no masked stores).
    materialize=False: aliased no-op kernel.  Only truly zero-cost when the
                      input buffer is donated (use `identity_donated`);
                      otherwise XLA inserts a defensive copy beforehand.
    """
    if materialize:
        return _identity_dma_copy(x)
    return _identity_alias(x)


if __name__ == "__main__":
    key = jax.random.PRNGKey(0)
    # NCHW input consistent with a conv-layer module: batch=2, C=4, H=W=16.
    x = jax.random.normal(key, (2, 4, 16, 16), dtype=jnp.float32)

    # Default path: single HBM->HBM DMA (input is small).
    y = jax.block_until_ready(identity(x))
    assert y.shape == x.shape and y.dtype == x.dtype
    assert bool(jnp.all(y == x))

    # Zero-copy path with genuine buffer donation (x2 is consumed; compare the
    # result against the untouched original x, which holds identical values).
    x2 = jax.random.normal(key, (2, 4, 16, 16), dtype=jnp.float32)
    y2 = jax.block_until_ready(identity_donated(x2))
    assert y2.shape == x.shape and y2.dtype == x.dtype
    assert bool(jnp.all(y2 == x))

    # Aliased path without donation (still correct; XLA supplies the copy).
    y3 = jax.block_until_ready(identity(x, materialize=False))
    assert bool(jnp.all(y3 == x))

    # Non-(8,128)-aligned and sub-32-bit inputs: the DMA copy is layout-
    # agnostic, so there is no masked-store penalty for these shapes.
    for shape, dt in (((3, 5, 7), jnp.float32), ((2, 4, 16, 16), jnp.bfloat16)):
        xi = jax.random.normal(jax.random.PRNGKey(1), shape, dtype=dt)
        yi = jax.block_until_ready(identity(xi))
        assert yi.shape == xi.shape and yi.dtype == xi.dtype
        assert bool(jnp.all(yi == xi))

    # A 4 MiB array exercises the chunked path (4 concurrent in-flight DMAs).
    xl = jax.random.normal(jax.random.PRNGKey(2), (16, 256, 256), jnp.float32)
    yl = jax.block_until_ready(identity(xl))
    assert bool(jnp.all(yl == xl))

    print("KERNEL_OK")
</pallas_src>

<mosaic_0001>
module attributes {stable_mosaic.version = 11 : i64} {
  func.func @kernel(%arg0: memref<2x4x16x16xf32, #tpu.memory_space<any>>, %arg1: memref<2x4x16x16xf32, #tpu.memory_space<any>>, %arg2: memref<1x!tpu.dma_semaphore, #tpu.memory_space<semaphore_mem>>) attributes {dimension_semantics = [], scalar_prefetch = 0 : i64, scratch_operands = 1 : i64, tpu.core_type = #tpu.core_type<tc>} {
    %c0_i32 = arith.constant 0 : i32
    %0 = tpu.memref_slice %arg2[%c0_i32] : memref<1x!tpu.dma_semaphore, #tpu.memory_space<semaphore_mem>> -> memref<1x!tpu.dma_semaphore, #tpu.memory_space<semaphore_mem>>
    %1 = tpu.memref_squeeze %0 : memref<1x!tpu.dma_semaphore, #tpu.memory_space<semaphore_mem>> -> memref<!tpu.dma_semaphore, #tpu.memory_space<semaphore_mem>>
    tpu.enqueue_dma source(%arg0 : memref<2x4x16x16xf32, #tpu.memory_space<any>>) target(%arg1 : memref<2x4x16x16xf32, #tpu.memory_space<any>>) target_semaphore(%1 : memref<!tpu.dma_semaphore, #tpu.memory_space<semaphore_mem>>)
    %c0_i32_0 = arith.constant 0 : i32
    %2 = tpu.memref_slice %arg2[%c0_i32_0] : memref<1x!tpu.dma_semaphore, #tpu.memory_space<semaphore_mem>> -> memref<1x!tpu.dma_semaphore, #tpu.memory_space<semaphore_mem>>
    %3 = tpu.memref_squeeze %2 : memref<1x!tpu.dma_semaphore, #tpu.memory_space<semaphore_mem>> -> memref<!tpu.dma_semaphore, #tpu.memory_space<semaphore_mem>>
    tpu.wait_dma2 semaphore(%3 : memref<!tpu.dma_semaphore, #tpu.memory_space<semaphore_mem>>) src(%arg0 : memref<2x4x16x16xf32, #tpu.memory_space<any>>) dst(%arg1 : memref<2x4x16x16xf32, #tpu.memory_space<any>>)
    return
  }
}

</mosaic_0001>

<bundles_post_ra>
// kernel: tpu_custom_call.1
= control target key start
LH: loop header
LB: loop body
LE: loop exit
PB: predicated region body
PF: predicated region fallthrough
CT: control target
= control target key end

     0   :  { %s30_s6 = smov [#allocation2]   ;;  %s31_s7 = smov 131072   ;;  %s49_s0 = inlined_call_operand.hbm [shape: f32[2,4,16,16], index: 0, kind: input, shape index: {}]   ;;  %s50_s1 = inlined_call_operand.hbm [shape: f32[2,4,16,16], index: 1, kind: output, shape index: {}]  }
   0x1   :  { %s32_s8 = smov 0  }
   0x2   :  { %12 = dma.general %s49_s0, 2048, %s50_s1, %s30_s6, %s31_s7, [#allocation4], %s32_s8, 0  }
   0x3   :  { %28 = dma.done.wait [#allocation2], 2048 }
   0x4   :  { %29 = vsyncadd [#allocation2], 4294965248 }
   0x5   :  { %18 = vsyncmov [#allocation2] }
   0x8   :  { %s19_s13 = vpop.sfrf %18 }
   0x9   :  { %p24_p0 = scmp.ne.s32.totalorder %s19_s13, 0 }
   0xb   :  { %23 = shalt.err (%p24_p0)  }

</bundles_post_ra>
